<compile_context>
chip_gen: v6e
topology: v6e:2x2x1
jax: 0.10.0
libtpu: 0.0.40
codegen_flags: <defaults>
</compile_context>

<pallas_src>
import functools

import jax
import jax.numpy as jnp
from jax import lax
from jax.experimental import pallas as pl
from jax.experimental.pallas import tpu as pltpu

# TODO(synk): the repo's `l2_normalize` is not shown; we assume the
# F.normalize-style clamp  x / max(||x||, eps)  with eps = 1e-12.
_EPS = 1e-12


def _gre_none_kernel(x_ref, o_ref, *, f, s):
    """One grid step over rows of the flattened (b*n, f*s) view.

    x_ref: (tile_rows, f*s)  input block (contiguous in HBM)
    o_ref: (tile_rows, f)    output block
    """
    fs = f * s
    xw = x_ref[...].astype(jnp.float32)                        # (T, f*s)

    # Selection matrix E[k, j] = 1.0 iff k == j*s, i.e. it picks the
    # (ssn=0, srn=0) element of feature j.  Built from 2-D iotas (cheap VPU
    # work, fully hidden under the block DMA).
    k_idx = lax.broadcasted_iota(jnp.int32, (fs, f), 0)
    j_idx = lax.broadcasted_iota(jnp.int32, (fs, f), 1)
    e = jnp.where(k_idx == j_idx * s, 1.0, 0.0).astype(jnp.bfloat16)

    # Stride-s gather + sublane->lane relayout in one MXU pass:
    #   z[t, j] = sum_k xw[t, k] * E[k, j] = xw[t, j*s].
    # The hi/lo bf16 split keeps this exact to ~2^-17 relative (E entries are
    # exactly representable in bf16; accumulation is in f32).
    x_hi = xw.astype(jnp.bfloat16)
    x_lo = (xw - x_hi.astype(jnp.float32)).astype(jnp.bfloat16)
    z = (jnp.dot(x_hi, e, preferred_element_type=jnp.float32) +
         jnp.dot(x_lo, e, preferred_element_type=jnp.float32))  # (T, f)

    # L2 normalization over the feature dim (f32 accumulation).
    sq_sum = jnp.sum(z * z, axis=-1, keepdims=True)             # (T, 1)
    inv = 1.0 / jnp.maximum(jnp.sqrt(sq_sum), _EPS)
    o_ref[...] = (z * inv).astype(o_ref.dtype)


def _choose_tile_rows(n_rows, fs):
    """Pick a row-tile size targeting ~2 MiB f32 input blocks (near the HBM
    roofline per the measured tile-size table) while staying far below the
    v7x 64 MiB / 32 MiB-scoped VMEM budget even with double buffering."""
    lane_padded = ((fs + 127) // 128) * 128
    target_bytes = 2 * 1024 * 1024
    t = target_bytes // (lane_padded * 4)
    t = max(16, min(int(t), 4096))
    t = (t // 16) * 16              # multiple of 16 (bf16 sublane packing)
    if n_rows <= t:
        return n_rows               # single full-extent block
    return t


def gre_none_forward(x, *, tile_rows=None):
    """GRENone forward: x (b, n, f, ssn, srn) -> (b, n, f)."""
    b, n, f, ssn, srn = x.shape
    s = ssn * srn
    fs = f * s
    rows = b * n

    # Layout-preserving (free) reshape: each row is a contiguous f*ssn*srn slab.
    xf = x.reshape(rows, fs)

    t = tile_rows if tile_rows is not None else _choose_tile_rows(rows, fs)
    grid = (pl.cdiv(rows, t),)      # ragged tail (if any) handled by Pallas

    out = pl.pallas_call(
        functools.partial(_gre_none_kernel, f=f, s=s),
        out_shape=jax.ShapeDtypeStruct((rows, f), x.dtype),
        grid_spec=pl.GridSpec(
            grid=grid,
            in_specs=[pl.BlockSpec((t, fs), lambda i: (i, 0))],
            out_specs=pl.BlockSpec((t, f), lambda i: (i, 0)),
        ),
        compiler_params=pltpu.CompilerParams(
            # Many independent row tiles -> both v7x TensorCores get work;
            # no-op on single-TC v5e/v6e.
            dimension_semantics=("parallel",),
        ),
    )(xf)
    return out.reshape(b, n, f)


def _reference(x):
    """Pure-JAX reference of the PyTorch forward (normalize over axis=2,
    then take the (ssn=0, srn=0) slice)."""
    x32 = x.astype(jnp.float32)
    norm = jnp.sqrt(jnp.sum(x32 * x32, axis=2, keepdims=True))
    xn = x32 / jnp.maximum(norm, _EPS)
    return xn[:, :, :, 0, 0].astype(x.dtype)


if __name__ == "__main__":
    key = jax.random.PRNGKey(0)
    b, n, f, ssn, srn = 2, 8, 32, 3, 3
    x = jax.random.normal(key, (b, n, f, ssn, srn), dtype=jnp.float32)

    ref = _reference(x)

    # Default tiling (single full-extent block at this small size).
    out = jax.block_until_ready(gre_none_forward(x))
    assert out.shape == (b, n, f)
    assert jnp.allclose(out, ref, atol=1e-5, rtol=1e-5), (
        "max abs err = %g" % float(jnp.max(jnp.abs(out - ref))))

    # Forced small tiles -> exercises the multi-step pipelined grid path.
    out2 = jax.block_until_ready(gre_none_forward(x, tile_rows=8))
    assert jnp.allclose(out2, ref, atol=1e-5, rtol=1e-5), (
        "max abs err = %g" % float(jnp.max(jnp.abs(out2 - ref))))

    print("KERNEL_OK")
</pallas_src>

<mosaic_0001>
module attributes {stable_mosaic.version = 11 : i64} {
  func.func @_gre_none_kernel(%arg0: i32, %arg1: memref<16x288xf32, #tpu.memory_space<vmem>>, %arg2: memref<16x32xf32, #tpu.memory_space<vmem>>) attributes {dimension_semantics = [#tpu.dimension_semantics<parallel>], iteration_bounds = array<i64: 1>, scalar_prefetch = 0 : i64, scratch_operands = 0 : i64, tpu.core_type = #tpu.core_type<tc>, window_params = [{transform_indices = @transform_0, window_bounds = array<i64: 16, 288>}, {transform_indices = @transform_1, window_bounds = array<i64: 16, 32>}]} {
    %c0 = arith.constant 0 : index
    %c0_0 = arith.constant 0 : index
    %0 = vector.load %arg1[%c0, %c0_0] : memref<16x288xf32, #tpu.memory_space<vmem>>, vector<16x288xf32>
    %1 = tpu.iota {dimensions = array<i32: 0>} : vector<288x32xi32>
    %2 = tpu.iota {dimensions = array<i32: 1>} : vector<288x32xi32>
    %c9_i32 = arith.constant 9 : i32
    %3 = vector.broadcast %c9_i32 : i32 to vector<288x32xi32>
    %4 = arith.muli %2, %3 : vector<288x32xi32>
    %5 = arith.cmpi eq, %1, %4 : vector<288x32xi32>
    %cst = arith.constant 1.000000e+00 : f32
    %cst_1 = arith.constant 0.000000e+00 : f32
    %6 = vector.broadcast %cst : f32 to vector<288x32xf32>
    %7 = vector.broadcast %cst_1 : f32 to vector<288x32xf32>
    %8 = arith.select %5, %6, %7 : vector<288x32xi1>, vector<288x32xf32>
    %9 = arith.truncf %8 : vector<288x32xf32> to vector<288x32xbf16>
    %10 = arith.truncf %0 : vector<16x288xf32> to vector<16x288xbf16>
    %11 = arith.extf %10 : vector<16x288xbf16> to vector<16x288xf32>
    %12 = arith.subf %0, %11 : vector<16x288xf32>
    %13 = arith.truncf %12 : vector<16x288xf32> to vector<16x288xbf16>
    %cst_2 = arith.constant dense<0.000000e+00> : vector<16x32xf32>
    %14 = tpu.matmul %10, %9, %cst_2 {dimension_numbers = #tpu.dot_dimension_numbers<[1], [0], [0], [1], [0, 0, 1, 1], [], []>} : vector<16x288xbf16>, vector<288x32xbf16>, vector<16x32xf32> -> vector<16x32xf32>
    %cst_3 = arith.constant dense<0.000000e+00> : vector<16x32xf32>
    %15 = tpu.matmul %13, %9, %cst_3 {dimension_numbers = #tpu.dot_dimension_numbers<[1], [0], [0], [1], [0, 0, 1, 1], [], []>} : vector<16x288xbf16>, vector<288x32xbf16>, vector<16x32xf32> -> vector<16x32xf32>
    %16 = arith.addf %14, %15 : vector<16x32xf32>
    %17 = arith.mulf %16, %16 : vector<16x32xf32>
    %cst_4 = arith.constant dense<0.000000e+00> : vector<16xf32>
    %18 = vector.multi_reduction <add>, %17, %cst_4 [1] : vector<16x32xf32> to vector<16xf32>
    %19 = vector.shape_cast %18 : vector<16xf32> to vector<16x1xf32>
    %20 = math.sqrt %19 : vector<16x1xf32>
    %cst_5 = arith.constant 9.99999996E-13 : f32
    %21 = vector.broadcast %cst_5 : f32 to vector<16x1xf32>
    %22 = arith.maximumf %20, %21 : vector<16x1xf32>
    %cst_6 = arith.constant 1.000000e+00 : f32
    %23 = vector.broadcast %cst_6 : f32 to vector<16x1xf32>
    %24 = arith.divf %23, %22 : vector<16x1xf32>
    %25 = vector.broadcast %24 : vector<16x1xf32> to vector<16x32xf32>
    %26 = arith.mulf %16, %25 : vector<16x32xf32>
    %c0_7 = arith.constant 0 : index
    %c0_8 = arith.constant 0 : index
    %27 = vector.load %arg2[%c0_7, %c0_8] : memref<16x32xf32, #tpu.memory_space<vmem>>, vector<16x32xf32>
    tpu.vector_store %arg2[%c0_7, %c0_8], %26 {strides = array<i32>} : memref<16x32xf32, #tpu.memory_space<vmem>>, vector<16x32xf32>,
    return
  }
  func.func @transform_0(%arg0: i32) -> (i32, i32) {
    %c0_i32 = arith.constant 0 : i32
    %c0_i32_0 = arith.constant 0 : i32
    return %arg0, %c0_i32 : i32, i32
  }
  func.func @transform_1(%arg0: i32) -> (i32, i32) {
    %c0_i32 = arith.constant 0 : i32
    %c0_i32_0 = arith.constant 0 : i32
    return %arg0, %c0_i32 : i32, i32
  }
}

</mosaic_0001>

<bundles_post_ra>
// kernel: tpu_custom_call.1
= control target key start
LH: loop header
LB: loop body
LE: loop exit
PB: predicated region body
PF: predicated region fallthrough
CT: control target
= control target key end

     0   :  { %6 = vsyncpa [#allocation3], 0  ;;  %s905_s0 = inlined_call_operand.hbm [shape: f32[16,288], index: 0, kind: input, shape index: {}]   ;;  %s906_s1 = inlined_call_operand.hbm [shape: f32[16,32], index: 1, kind: output, shape index: {}]  }
   0x1   :  { %7 = vsyncpa [#allocation4], 0  ;;  %s599_s6 = smov [#allocation2]  }
   0x2   :  { %s13_s7 = sshll.u32 %s599_s6, 4  ;;  %s14_s7 = int_to_ptr.vmem [resolvable:$true] %s13_s7 }
   0x3   :  { %s563_s8 = scalar_lea.vmem %s14_s7, 768  ;;  %p568_p1 = scmp.lt.s32.totalorder %s14_s7, %s14_s7 }
   0x4   :  { %p564_p0 = scmp.ne.s32.totalorder %s14_s7, %s563_s8  ;;  %p569_p2 = scmp.lt.s32.totalorder %s563_s8, %s563_s8 }
   0x6   :  { %p570_p3 = por %p569_p2, %p568_p1 }
   0x8   :  { %p571_p4 = pnand %p570_p3, %p564_p0 }
   0xa   :  { %574 = shalt.err (!%p571_p4)
}
   0xb   :  { %s600_s9 = smov 384   ;;  %s601_s10 = smov 24  }
   0xc   :  { %19 = dma.hbm_to_vmem [thread:$0]  %s905_s0, 768, %s14_s7, [#allocation3], %s600_s9, %s600_s9, %s601_s10  }
   0xd   :  { %595 = dma.done.wait [#allocation3], 768  }
   0xe   :  { %596 = vsyncadd [#allocation3], 4294966528  ;;  %v30_v0 = vlaneseq  ;;  %v602_v1 = vmov 0.0   ;;  %vm908_vm0 = vmmov 0   ;;  %v26_v14 = vld [vmem:[#allocation2 + $0x10] sm:$0xff]  ;;  %v29_v15 = vld [vmem:[#allocation2 + $0x28] sm:$0xff] }
   0xf   :  { %522 = vmatprep.subr.bf16.mxu1 %v602_v1  ;;  %526 = vmatprep.mubr.msk.bf16.mxu1 %vm908_vm0, %v602_v1  ;;  %v604_v16 = vmov 1.0|1.0   ;;  %v668_v25 = vpack.c.bf16 %v29_v15, %v26_v14  ;;  %v918_v28 = vmov 0  ;;  %v25_v53 = vld [vmem:[#allocation2 + $0x8] sm:$0xff]  ;;  %v28_v54 = vld [vmem:[#allocation2 + $0x20] sm:$0xff]  ;;  %v27_v59 = vld [vmem:[#allocation2 + $0x18] sm:$0xff] }
  0x10   :  { %v624_v2 = vshrl.u32 %v30_v0, 7  ;;  %v68_v3 = vand.u32 127, %v30_v0  ;;  %v161_v57 = vpack.c.bf16 %v28_v54, %v25_v53  ;;  %v24_v58 = vld [vmem:[#allocation2] sm:$0xff]  ;;  %s605_s0 = smov [#allocation5]  }
  0x11   :  { %v165_v29 = vunpack.c.l.bf16 %v668_v25  ;;  %v168_v31 = vunpack.c.h.bf16 %v668_v25  ;;  %s386_s13 = sshll.u32 %s605_s0, 4  ;;  %s387_s13 = int_to_ptr.vmem [resolvable:$true] %s386_s13 }
  0x12   :  { %v61_v4 = vadd.s32 240, %v624_v2  ;;  %v62_v5 = vadd.s32 248, %v624_v2  ;;  %v628_v6 = vmul.u32 9, %v68_v3  ;;  %v65_v7 = vadd.s32 272, %v624_v2  ;;  %s575_s14 = scalar_lea.vmem %s387_s13, 256  ;;  %p580_p6 = scmp.lt.s32.totalorder %s387_s13, %s387_s13 }
  0x13   :  { %v66_v8 = vadd.s32 280, %v624_v2  ;;  %v45_v9 = vadd.s32 112, %v624_v2  ;;  %v46_v10 = vadd.s32 120, %v624_v2  ;;  %v59_v11 = vadd.s32 224, %v624_v2  ;;  %p576_p5 = scmp.ne.s32.totalorder %s387_s13, %s575_s14  ;;  %p581_p7 = scmp.lt.s32.totalorder %s575_s14, %s575_s14 }
  0x14   :  { %vm100_vm1 = vcmp.eq.s32.totalorder %v61_v4, %v628_v6  ;;  %vm101_vm2 = vcmp.eq.s32.totalorder %v62_v5, %v628_v6  ;;  %vm104_vm3 = vcmp.eq.s32.totalorder %v65_v7, %v628_v6  ;;  %v60_v12 = vadd.s32 232, %v624_v2 }
  0x15   :  { %vm639_vm4 = vmpackc.low %vm101_vm2, %vm100_vm1  ;;  %vm105_vm5 = vcmp.eq.s32.totalorder %v66_v8, %v628_v6  ;;  %vm84_vm6 = vcmp.eq.s32.totalorder %v45_v9, %v628_v6  ;;  %vm85_vm7 = vcmp.eq.s32.totalorder %v46_v10, %v628_v6  ;;  %vm98_vm8 = vcmp.eq.s32.totalorder %v59_v11, %v628_v6  ;;  %p582_p8 = por %p581_p7, %p580_p6 }
  0x16   :  { %472 = vmatprep.subr.msk.bf16.mxu0 %vm639_vm4, %v604_v16  ;;  %vm650_vm9 = vmpackc.low %vm105_vm5, %vm104_vm3  ;;  %vm99_vm10 = vcmp.eq.s32.totalorder %v60_v12, %v628_v6  ;;  %v63_v18 = vadd.s32 256, %v624_v2  ;;  %v64_v19 = vadd.s32 264, %v624_v2  ;;  %v43_v20 = vadd.s32 96, %v624_v2 }
  0x17   :  { %523 = vmatpush3.bf16.msk.msra.mxu1 %vm650_vm9, %v604_v16  ;;  %vm661_vm11 = vmpackc.low %vm85_vm7, %vm84_vm6  ;;  %v44_v22 = vadd.s32 104, %v624_v2  ;;  %v57_v23 = vadd.s32 208, %v624_v2  ;;  %v58_v24 = vadd.s32 216, %v624_v2  ;;  %v41_v27 = vadd.s32 80, %v624_v2  ;;  %p583_p9 = pnand %p582_p8, %p576_p5 }
  0x18   :  { %473 = vmatpush3.bf16.msk.msra.mxu0 %vm661_vm11, %v604_v16  ;;  %524 = vmatprep.subr.bf16.mxu1 %v602_v1  ;;  %vm676_vm12 = vmpackc.low %vm99_vm10, %vm98_vm8  ;;  %vm102_vm13 = vcmp.eq.s32.totalorder %v63_v18, %v628_v6  ;;  %vm103_vm14 = vcmp.eq.s32.totalorder %v64_v19, %v628_v6  ;;  %vm82_vm15 = vcmp.eq.s32.totalorder %v43_v20, %v628_v6  ;;  %v42_v32 = vadd.s32 88, %v624_v2 }
  0x19   :  { %474 = vmatprep.subr.msk.bf16.mxu0 %vm676_vm12, %v604_v16  ;;  %vm687_vm1 = vmpackc.low %vm103_vm14, %vm102_vm13  ;;  %vm83_vm2 = vcmp.eq.s32.totalorder %v44_v22, %v628_v6  ;;  %vm96_vm3 = vcmp.eq.s32.totalorder %v57_v23, %v628_v6  ;;  %vm97_vm5 = vcmp.eq.s32.totalorder %v58_v24, %v628_v6  ;;  %vm80_vm7 = vcmp.eq.s32.totalorder %v41_v27, %v628_v6 }
  0x1a   :  { %v919_v28 = vsel %vm687_vm1, 4294967295, %v918_v28  ;;  %vm695_vm6 = vmpackc.low %vm83_vm2, %vm82_vm15  ;;  %v55_v33 = vadd.s32 192, %v624_v2  ;;  %v171_v35 = vsub.f32 %v26_v14, %v165_v29  ;;  %v56_v36 = vadd.s32 200, %v624_v2 }
  0x1b   :  { %525 = vmatpush3.bf16.msk.msra.mxu1 %vm687_vm1, %v604_v16  ;;  %vm706_vm8 = vmpackc.low %vm97_vm5, %vm96_vm3  ;;  %v39_v37 = vadd.s32 64, %v624_v2  ;;  %v40_v38 = vadd.s32 72, %v624_v2  ;;  %v174_v39 = vsub.f32 %v29_v15, %v168_v31  ;;  %vm81_vm10 = vcmp.eq.s32.totalorder %v42_v32, %v628_v6 }
  0x1c   :  { %475 = vmatpush3.bf16.msk.msra.mxu0 %vm695_vm6, %v604_v16  ;;  %497 = vmatprep.subr.msk.bf16.mxu1 %vm639_vm4, %v604_v16  ;;  %vm94_vm13 = vcmp.eq.s32.totalorder %v55_v33, %v628_v6  ;;  %v53_v40 = vadd.s32 176, %v624_v2  ;;  %vm907_vm14 = vcmask 261120   ;;  %vm727_vm15 = vmpackc.low %vm81_vm10, %vm80_vm7  ;;  %vm95_vm4 = vcmp.eq.s32.totalorder %v56_v36, %v628_v6 }
  0x1d   :  { %476 = vmatprep.subr.msk.bf16.mxu0 %vm706_vm8, %v604_v16  ;;  %vm78_vm2 = vcmp.eq.s32.totalorder %v39_v37, %v628_v6  ;;  %v54_v42 = vadd.s32 184, %v624_v2  ;;  %v177_v43 = vpack.c.bf16 %v174_v39, %v171_v35  ;;  %vm734_vm3 = vmpackc.low %vm95_vm4, %vm94_vm13  ;;  %vm79_vm5 = vcmp.eq.s32.totalorder %v40_v38, %v628_v6 }
  0x1e   :  { %v37_v45 = vadd.s32 48, %v624_v2  ;;  %v38_v46 = vadd.s32 56, %v624_v2  ;;  %vm92_vm7 = vcmp.eq.s32.totalorder %v53_v40, %v628_v6  ;;  %v51_v47 = vadd.s32 160, %v624_v2  ;;  %vm757_vm13 = vmpackc.low %vm79_vm5, %vm78_vm2 }
  0x1f   :  { %vm93_vm10 = vcmp.eq.s32.totalorder %v54_v42, %v628_v6  ;;  %v52_v48 = vadd.s32 168, %v624_v2  ;;  %527 = vmatmul.mubr.msk.bf16.vlgmr.msra.gmra.mxu1 %vm907_vm14, %v177_v43  ;;  %v35_v50 = vadd.s32 32, %v624_v2  ;;  %v36_v51 = vadd.s32 40, %v624_v2 }
  0x20   :  { %477 = vmatpush3.bf16.msk.msra.mxu0 %vm727_vm15, %v604_v16  ;;  %498 = vmatpush3.bf16.msk.msra.mxu1 %vm661_vm11, %v604_v16  ;;  %v49_v52 = vadd.s32 144, %v624_v2  ;;  %vm769_vm11 = vmpackc.low %vm93_vm10, %vm92_vm7  ;;  %vm76_vm4 = vcmp.eq.s32.totalorder %v37_v45, %v628_v6  ;;  %vm77_vm2 = vcmp.eq.s32.totalorder %v38_v46, %v628_v6  ;;  %vm90_vm5 = vcmp.eq.s32.totalorder %v51_v47, %v628_v6 }
  0x21   :  { %478 = vmatprep.subr.msk.bf16.mxu0 %vm734_vm3, %v604_v16  ;;  %499 = vmatprep.subr.msk.bf16.mxu1 %vm676_vm12, %v604_v16  ;;  %vm91_vm14 = vcmp.eq.s32.totalorder %v52_v48, %v628_v6  ;;  %v50_v56 = vadd.s32 152, %v624_v2  ;;  %vm787_vm12 = vmpackc.low %vm77_vm2, %vm76_vm4  ;;  %vm74_vm7 = vcmp.eq.s32.totalorder %v35_v50, %v628_v6  ;;  %vm75_vm10 = vcmp.eq.s32.totalorder %v36_v51, %v628_v6 }
  0x22   :  { %vm88_vm0 = vcmp.eq.s32.totalorder %v49_v52, %v628_v6  ;;  %vm797_vm1 = vmpackc.low %vm91_vm14, %vm90_vm5  ;;  %v33_v62 = vadd.s32 16, %v624_v2  ;;  %v34_v63 = vadd.s32 24, %v624_v2  ;;  %v164_v0 = vunpack.c.l.bf16 %v161_v57  ;;  %299 = vmatprep.mubr.bf16.mxu1 %v161_v57 }
  0x23   :  { %v167_v3 = vunpack.c.h.bf16 %v161_v57  ;;  %v47_v4 = vadd.s32 128, %v624_v2  ;;  %v48_v5 = vadd.s32 136, %v624_v2  ;;  %v160_v7 = vpack.c.bf16 %v27_v59, %v24_v58 }
  0x24   :  { %479 = vmatpush3.bf16.msk.msra.mxu0 %vm757_vm13, %v604_v16  ;;  %500 = vmatpush3.bf16.msk.msra.mxu1 %vm695_vm6, %v604_v16  ;;  %vm89_vm6 = vcmp.eq.s32.totalorder %v50_v56, %v628_v6  ;;  %v170_v8 = vsub.f32 %v25_v53, %v164_v0  ;;  %vm73_vm4 = vcmp.eq.s32.totalorder %v34_v63, %v628_v6  ;;  %v32_v12 = vadd.s32 8, %v624_v2 }
  0x25   :  { %480 = vmatprep.subr.msk.bf16.mxu0 %vm769_vm11, %v604_v16  ;;  %501 = vmatprep.subr.msk.bf16.mxu1 %vm706_vm8, %v604_v16  ;;  %v173_v9 = vsub.f32 %v28_v54, %v167_v3  ;;  %vm819_vm8 = vmpackc.low %vm75_vm10, %vm74_vm7  ;;  %vm86_vm2 = vcmp.eq.s32.totalorder %v47_v4, %v628_v6  ;;  %vm87_vm5 = vcmp.eq.s32.totalorder %v48_v5, %v628_v6  ;;  %v163_v14 = vunpack.c.l.bf16 %v160_v7 }
  0x26   :  { %vm828_vm14 = vmpackc.low %vm89_vm6, %vm88_vm0  ;;  %v166_v15 = vunpack.c.h.bf16 %v160_v7  ;;  %vm70_vm7 = vcmp.eq.s32.totalorder %v624_v2, %v628_v6 }
  0x27   :  { %v176_v13 = vpack.c.bf16 %v173_v9, %v170_v8  ;;  %v169_v20 = vsub.f32 %v24_v58, %v163_v14 }
  0x28   :  { %481 = vmatpush3.bf16.msk.msra.mxu0 %vm787_vm12, %v604_v16  ;;  %502 = vmatpush3.bf16.msk.msra.mxu1 %vm727_vm15, %v604_v16  ;;  %vm72_vm15 = vcmp.eq.s32.totalorder %v33_v62, %v628_v6  ;;  %v172_v21 = vsub.f32 %v27_v59, %v166_v15 }
  0x29   :  { %482 = vmatprep.subr.msk.bf16.mxu0 %vm797_vm1, %v604_v16  ;;  %503 = vmatprep.subr.msk.bf16.mxu1 %vm734_vm3, %v604_v16  ;;  %vm846_vm0 = vmpackc.low %vm73_vm4, %vm72_vm15 }
  0x2a   :  { %214 = vmatprep.mubr.bf16.mxu0 %v176_v13  ;;  %vm853_vm3 = vmpackc.low %vm87_vm5, %vm86_vm2  ;;  %v175_v2 = vpack.c.bf16 %v172_v21, %v169_v20 }
  0x2c   :  { %483 = vmatpush3.bf16.msk.msra.mxu0 %vm819_vm8, %v604_v16  ;;  %504 = vmatpush3.bf16.msk.msra.mxu1 %vm757_vm13, %v604_v16  ;;  %vm71_vm13 = vcmp.eq.s32.totalorder %v32_v12, %v628_v6 }
  0x2d   :  { %484 = vmatprep.subr.msk.bf16.mxu0 %vm828_vm14, %v604_v16  ;;  %505 = vmatprep.subr.msk.bf16.mxu1 %vm769_vm11, %v604_v16  ;;  %vm412_vm11 = vmpackc.low %vm71_vm13, %vm70_vm7 }
  0x30   :  { %485 = vmatpush3.bf16.msk.msra.mxu0 %vm846_vm0, %v604_v16  ;;  %506 = vmatpush3.bf16.msk.msra.mxu1 %vm787_vm12, %v604_v16  ;;  %vm945_vm12 = vnez %v919_v28 }
  0x31   :  { %486 = vmatprep.subr.msk.bf16.mxu0 %vm853_vm3, %v604_v16  ;;  %507 = vmatprep.subr.msk.bf16.mxu1 %vm797_vm1, %v604_v16  ;;  %vm944_vm1 = vmmov 0  }
  0x34   :  { %487 = vmatpush3.bf16.msk.msra.mxu0 %vm412_vm11, %v604_v16  ;;  %508 = vmatpush3.bf16.msk.msra.mxu1 %vm819_vm8, %v604_v16 }
  0x35   :  { %530 = vmatprep.subr.bf16.mxu0 %v602_v1  ;;  %509 = vmatprep.subr.msk.bf16.mxu1 %vm828_vm14, %v604_v16 }
  0x37   :  { %215 = vmatmul.mubr.bf16.vlgmr.msra.gmra.mxu0 %v175_v2 }
  0x38   :  { %531 = vmatpush3.bf16.msk.msra.mxu0 %vm650_vm9, %v604_v16  ;;  %534 = vmatprep.mubr.msk.bf16.mxu0 %vm944_vm1, %v602_v1  ;;  %vm946_vm9 = vcmask 261120  }
  0x39   :  { %510 = vmatpush3.bf16.msk.msra.mxu1 %vm846_vm0, %v604_v16  ;;  %532 = vmatprep.subr.bf16.mxu0 %v602_v1  ;;  %vm947_vm10 = vmmov %vm946_vm9 }
  0x3a   :  { %511 = vmatprep.subr.msk.bf16.mxu1 %vm853_vm3, %v604_v16  ;;  %vm948_vm6 = vmmov %vm946_vm9 }
  0x3b   :  { %vm949_vm2 = vmmov %vm948_vm6 }
  0x3c   :  { %533 = vmatpush3.bf16.msk.msra.mxu0 %vm945_vm12, %v604_v16  ;;  %vm950_vm5 = vmmov %vm949_vm2 }
  0x3d   :  { %512 = vmatpush3.bf16.msk.msra.mxu1 %vm412_vm11, %v604_v16 }
  0x3f   :  { %535 = vmatmul.mubr.msk.bf16.vlgmr.msra.gmra.mxu0 %vm946_vm9, %v668_v25 }
  0x40   :  { %300 = vmatmul.mubr.bf16.vlgmr.msra.gmra.mxu1 %v160_v7 }
  0xdf   :  { %v257_v6 = vpop.f32.mrf.mxu1 }
  0xe1   :  { %v528_v17 = vpop.f32.mrf.mxu1 }
  0xe3   :  { %v260_v22 = vpop.f32.mrf.mxu1 }
  0xe5   :  { %v529_v23 = vpop.f32.mrf.mxu1 }
  0xf7   :  { %v488_v24 = vpop.f32.mrf.mxu0 }
  0xf9   :  { %v489_v1 = vpop.f32.mrf.mxu0 }
  0xfa   :  { %v490_v29 = vadd.f32 %v489_v1, %v488_v24 }
  0xfb   :  { %v491_v26 = vpop.f32.mrf.mxu0 }
  0xfc   :  { %v258_v33 = vadd.f32 %v490_v29, %v257_v6 }
  0xfd   :  { %v492_v27 = vpop.f32.mrf.mxu0 }
  0xfe   :  { %v493_v34 = vadd.f32 %v492_v27, %v491_v26 }
  0xff   :  { %v342_v30 = vpop.f32.mrf.mxu0 }
 0x100   :  { %v513_v31 = vpop.f32.mrf.mxu1  ;;  %v261_v39 = vadd.f32 %v493_v34, %v260_v22 }
 0x101   :  { %v536_v32 = vpop.f32.mrf.mxu0 }
 0x102   :  { %v514_v28 = vpop.f32.mrf.mxu1 }
 0x103   :  { %v515_v16 = vadd.f32 %v514_v28, %v513_v31  ;;  %v345_v35 = vpop.f32.mrf.mxu0 }
 0x104   :  { %v516_v36 = vpop.f32.mrf.mxu1 }
 0x105   :  { %v302_v25 = vadd.f32 %v515_v16, %v258_v33  ;;  %v537_v37 = vpop.f32.mrf.mxu0 }
 0x106   :  { %v517_v38 = vpop.f32.mrf.mxu1 }
 0x107   :  { %v518_v40 = vadd.f32 %v517_v38, %v516_v36  ;;  %v343_v41 = vadd.f32 %v342_v30, %v302_v25 }
 0x109   :  { %v305_v42 = vadd.f32 %v518_v40, %v261_v39  ;;  %v349_v43 = vmul.f32 %v343_v41, %v343_v41 }
 0x10b   :  { %v351_v44 = vsel %vm947_vm10, %v349_v43, 0.0  ;;  %v346_v45 = vadd.f32 %v345_v35, %v305_v42 }
 0x10c   :  { %352 = vadd.xlane.f32.xlu0 %v351_v44 }
 0x10d   :  { %v350_v46 = vmul.f32 %v346_v45, %v346_v45 }
 0x10f   :  { %v354_v47 = vsel %vm948_vm6, %v350_v46, 0.0 }
 0x110   :  { %355 = vadd.xlane.f32.xlu0 %v354_v47 }
 0x195   :  { %v353_v48 = vpop.xlane.xlu0 %352 }
 0x196   :  { %547 = vrsqrt.f32 %v353_v48  ;;  %vm359_vm8 = vcmp.eq.f32.partialorder %v353_v48, inf  ;;  %v362_v52 = vand.u32 2147483648, %v353_v48  ;;  %vm361_vm14 = vcmp.eq.f32.partialorder %v353_v48, 0.0 }
 0x199   :  { %v356_v49 = vpop.xlane.xlu0 %355 }
 0x19a   :  { %549 = vrsqrt.f32 %v356_v49  ;;  %vm366_vm15 = vcmp.eq.f32.partialorder %v356_v49, inf  ;;  %v369_v58 = vand.u32 2147483648, %v356_v49  ;;  %vm368_vm4 = vcmp.eq.f32.partialorder %v356_v49, 0.0 }
 0x1a3   :  { %v548_v50 = vpop.eup %547 }
 0x1a4   :  { %v358_v51 = vmul.f32 %v548_v50, %v353_v48 }
 0x1a6   :  { %v360_v53 = vsel %vm359_vm8, %v353_v48, %v358_v51 }
 0x1a7   :  { %v550_v54 = vpop.eup %549  ;;  %v363_v55 = vsel %vm361_vm14, %v362_v52, %v360_v53 }
 0x1a8   :  { %v371_v56 = vmax.f32 %v363_v55, 1e-12  ;;  %v365_v57 = vmul.f32 %v550_v54, %v356_v49 }
 0x1aa   :  { %551 = vrcp.f32 %v371_v56  ;;  %v367_v59 = vsel %vm366_vm15, %v356_v49, %v365_v57 }
 0x1ab   :  { %v370_v60 = vsel %vm368_vm4, %v369_v58, %v367_v59 }
 0x1ac   :  { %v372_v61 = vmax.f32 %v370_v60, 1e-12 }
 0x1ae   :  { %553 = vrcp.f32 %v372_v61 }
 0x1b7   :  { %v552_v62 = vpop.eup %551 }
 0x1b8   :  { %v377_v63 = vmul.f32 %v552_v62, %v343_v41 }
 0x1ba   :  { %379 = vst.msk [vmem:[#allocation5] sm:$0xff] %vm949_vm2, %v377_v63 }
 0x1bb   :  { %v554_v0 = vpop.eup %553 }
 0x1bc   :  { %v378_v3 = vmul.f32 %v554_v0, %v346_v45 }
 0x1be   :  { %380 = vst.msk [vmem:[#allocation5 + $0x8] sm:$0xff] %vm950_vm5, %v378_v3 }
 0x1bf   :  { %586 = shalt.err (!%p583_p9)
}
 0x1c0   :  { %s606_s15 = smov 128   ;;  %s607_s16 = smov 8  }
 0x1c1   :  { %392 = dma.vmem_to_hbm [thread:$0]  %s387_s13, 256, %s906_s1, [#allocation4], %s606_s15, %s606_s15, %s607_s16  }
 0x1c2   :  { %597 = dma.done.wait [#allocation4], 256  }
 0x1c3   :  { %598 = vsyncadd [#allocation4], 4294967040 }
 0x1c4   :  { %396 = vsyncpa [#allocation3], 1 }
 0x1c5   :  { %397 = vsyncpa [#allocation4], 1 }

</bundles_post_ra>
